<compile_context>
chip_gen: v6e
topology: v6e:2x2x1
jax: 0.10.0
libtpu: 0.0.40
codegen_flags: <defaults>
</compile_context>

<pallas_src>
import functools

import jax
import jax.numpy as jnp
from jax.experimental import pallas as pl
from jax.experimental.pallas import tpu as pltpu


# ---------------------------------------------------------------------------
# Parameter setup (mirrors BQuantConv1d_scatter_add.__init__, method='sup')
# ---------------------------------------------------------------------------
def quantize_sup(w0, k):
    """Residual binarization. w0: (nx, nf).  Returns B (k, nx, nf) in {0,1}
    and scale (nf, k)."""
    binary_list, scale_list = [], []
    for _ in range(k):
        absw0 = jnp.abs(w0)
        sign = w0 > 0
        mini = jnp.min(absw0, axis=0)
        maxi = jnp.max(absw0, axis=0)
        s = (mini + maxi) / 2.0
        scale_list.append(s)
        b = jnp.where(sign, 1.0, 0.0).astype(w0.dtype)
        binary_list.append(b)
        w0 = w0 - jnp.where(sign, s[None, :], -s[None, :])
    scale = jnp.stack(scale_list, axis=1)   # (nf, k)
    B = jnp.stack(binary_list, axis=0)      # (k, nx, nf)
    return B, scale


def pack_binary(B, k, nx, nf):
    """Pack 8 binary weights per byte exactly like the reference:
    (k, nx, nf) -> int8 (nf, k, nx//8, 1)."""
    binary_exp = jnp.array([2 ** e for e in range(7, -1, -1)], dtype=jnp.float32)
    Bv = B.reshape(k, nx // 8, 8, nf)
    packed = jnp.einsum("r,kcrn->kcn", binary_exp, Bv)          # (k, nx//8, nf)
    packed_u8 = packed.astype(jnp.uint8)
    packed_i8 = jax.lax.bitcast_convert_type(packed_u8, jnp.int8)
    packed_i8 = jnp.transpose(packed_i8, (2, 0, 1))[..., None]  # (nf, k, nx//8, 1)
    return packed_i8


def unpack_signs(packed_i8, k, nx, nf):
    """Reverse of pack_binary (mirrors the bitwise_and unpack in forward),
    then map {0,1} -> {-1,+1}.  Returns (k, nx, nf) float32."""
    binary_exp = jnp.array([2 ** e for e in range(7, -1, -1)], dtype=jnp.uint8)
    exps_i8 = jax.lax.bitcast_convert_type(binary_exp, jnp.int8)           # (8,)
    b = jnp.broadcast_to(packed_i8, (nf, k, nx // 8, 8))
    bits01 = (jnp.bitwise_and(b, exps_i8.reshape(1, 1, 1, 8)) != 0)
    w = bits01.reshape(nf, k, nx).astype(jnp.float32)                      # (nf, k, nx)
    sgn = 2.0 * w - 1.0
    return jnp.transpose(sgn, (1, 2, 0))                                   # (k, nx, nf)


def effective_weight(packed_i8, scale_nf_k, k, nx, nf):
    """Collapse the per-bit reduction:  W_eff = sum_b scale[:,b] * sgn[b]."""
    sgn = unpack_signs(packed_i8, k, nx, nf)                 # (k, nx, nf)
    return jnp.einsum("bif,fb->if", sgn, scale_nf_k)         # (nx, nf)


# ---------------------------------------------------------------------------
# Pallas kernel: tiled  out = x @ W_eff + bias
#   grid = (T_tiles, nf_tiles, K_tiles); K is the innermost reduction axis.
#   The output block is resident across K, so we accumulate directly into
#   o_ref (f32) and initialize it with the bias at k == 0 (no scratch needed).
# ---------------------------------------------------------------------------
def bquant_matmul_kernel(x_ref, w_ref, bias_ref, o_ref):
    kk = pl.program_id(2)

    @pl.when(kk == 0)
    def _():
        o_ref[...] = jnp.broadcast_to(bias_ref[...], o_ref.shape).astype(o_ref.dtype)

    o_ref[...] += jnp.dot(x_ref[...], w_ref[...],
                          preferred_element_type=jnp.float32)


@functools.partial(jax.jit, static_argnames=("tm", "tn", "tk"))
def _bquant_matmul(x2d_bf16, w_bf16, bias_f32, tm, tn, tk):
    T, K = x2d_bf16.shape
    _, N = w_bf16.shape
    grid = (T // tm, N // tn, K // tk)

    flops = 2 * T * K * N
    bytes_accessed = (x2d_bf16.size * 2 + w_bf16.size * 2
                      + bias_f32.size * 4 + T * N * 4)

    return pl.pallas_call(
        bquant_matmul_kernel,
        out_shape=jax.ShapeDtypeStruct((T, N), jnp.float32),
        grid_spec=pltpu.PrefetchScalarGridSpec(
            num_scalar_prefetch=0,
            grid=grid,
            in_specs=[
                pl.BlockSpec((tm, tk), lambda i, j, k: (i, k)),   # x tile (bf16)
                pl.BlockSpec((tk, tn), lambda i, j, k: (k, j)),   # W_eff tile (bf16)
                pl.BlockSpec((1, tn), lambda i, j, k: (0, j)),    # bias tile (f32)
            ],
            out_specs=pl.BlockSpec((tm, tn), lambda i, j, k: (i, j)),
        ),
        compiler_params=pltpu.CompilerParams(
            dimension_semantics=("parallel", "parallel", "arbitrary"),
            vmem_limit_bytes=48 * 1024 * 1024,
        ),
        cost_estimate=pl.CostEstimate(flops=flops, transcendentals=0,
                                      bytes_accessed=bytes_accessed),
    )(x2d_bf16, w_bf16, bias_f32)


def _round_up(a, b):
    return ((a + b - 1) // b) * b


def bquant_conv1d_forward(x, w_eff, bias, nx, nf):
    """Full forward matching the PyTorch quantized Conv1D: x (..., nx) -> (..., nf)."""
    size_out = x.shape[:-1] + (nf,)
    x2d = x.reshape(-1, nx)
    T = x2d.shape[0]

    # Tile sizes: lane-aligned (128) on nf/K, sublane-aligned (8) on T; capped
    # so that double-buffered bf16 tiles + the f32 output block comfortably fit
    # a 64 MiB (v7x) VMEM budget at real GPT-2 sizes.
    tm = min(256, _round_up(T, 8))
    tn = min(256, _round_up(nf, 128))
    tk = min(512, _round_up(nx, 128))
    T_pad = _round_up(T, tm)
    nf_pad = _round_up(nf, tn)
    nx_pad = _round_up(nx, tk)

    # Zero-pad to tile multiples (exact: padded K rows of W are zero) and cast
    # MXU inputs to bf16 (f32 accumulation inside the kernel).
    x_p = jnp.pad(x2d, ((0, T_pad - T), (0, nx_pad - nx))).astype(jnp.bfloat16)
    w_p = jnp.pad(w_eff, ((0, nx_pad - nx), (0, nf_pad - nf))).astype(jnp.bfloat16)
    b_p = jnp.pad(bias.reshape(1, nf), ((0, 0), (0, nf_pad - nf))).astype(jnp.float32)

    out = _bquant_matmul(x_p, w_p, b_p, tm, tn, tk)
    return out[:T, :nf].reshape(size_out)


if __name__ == "__main__":
    batch, seq, nx, nf, kbits = 2, 8, 32, 16, 8

    key = jax.random.PRNGKey(0)
    k1, k2, k3 = jax.random.split(key, 3)
    w = 0.1 * jax.random.normal(k1, (nx, nf), jnp.float32)   # conv1d.weight (nx, nf)
    bias = 0.1 * jax.random.normal(k2, (nf,), jnp.float32)   # conv1d.bias (nf,)
    x = jax.random.normal(k3, (batch, seq, nx), jnp.float32)

    # __init__ (method='sup'): residual binarization + int8 bit packing,
    # then collapse to a single effective weight for the forward pass.
    B, scale = quantize_sup(w, kbits)                 # B: (k, nx, nf), scale: (nf, k)
    packed = pack_binary(B, kbits, nx, nf)            # int8 (nf, k, nx//8, 1)
    w_eff = effective_weight(packed, scale, kbits, nx, nf)   # (nx, nf) f32

    out = bquant_conv1d_forward(x, w_eff, bias, nx, nf)
    out = jax.block_until_ready(out)
    assert out.shape == (batch, seq, nf)

    # Reference 1 (tight): same math at the kernel's input precision
    # (bf16 operands, f32 accumulation) -> validates the kernel itself.
    x_bf = x.reshape(-1, nx).astype(jnp.bfloat16).astype(jnp.float32)
    w_bf = w_eff.astype(jnp.bfloat16).astype(jnp.float32)
    ref_bf = (x_bf @ w_bf + bias).reshape(batch, seq, nf)
    assert jnp.allclose(out, ref_bf, rtol=1e-4, atol=1e-4), "mismatch vs bf16-precision reference"

    # Reference 2 (loose): exact per-bit scatter_add math in f32 -> validates
    # the algebraic collapse; bf16 casting of x/W_eff costs ~1e-3 relative.
    sgn_ref = unpack_signs(packed, kbits, nx, nf)              # (k, nx, nf)
    ref_f32 = (jnp.einsum("ti,bif,fb->tf", x.reshape(-1, nx), sgn_ref, scale)
               + bias).reshape(batch, seq, nf)
    assert jnp.allclose(out, ref_f32, rtol=5e-2, atol=5e-2), "mismatch vs f32 scatter_add reference"

    print("KERNEL_OK")
</pallas_src>

<mosaic_0001>
module attributes {stable_mosaic.version = 11 : i64} {
  func.func @bquant_matmul_kernel(%arg0: i32, %arg1: i32, %arg2: i32, %arg3: memref<16x128xbf16, #tpu.memory_space<vmem>>, %arg4: memref<128x128xbf16, #tpu.memory_space<vmem>>, %arg5: memref<1x128xf32, #tpu.memory_space<vmem>>, %arg6: memref<16x128xf32, #tpu.memory_space<vmem>>) attributes {dimension_semantics = [#tpu.dimension_semantics<parallel>, #tpu.dimension_semantics<parallel>, #tpu.dimension_semantics<arbitrary>], iteration_bounds = array<i64: 1, 1, 1>, scalar_prefetch = 0 : i64, scratch_operands = 0 : i64, tpu.core_type = #tpu.core_type<tc>, window_params = [{transform_indices = @transform_0, window_bounds = array<i64: 16, 128>}, {transform_indices = @transform_1, window_bounds = array<i64: 128, 128>}, {transform_indices = @transform_2, window_bounds = array<i64: 1, 128>}, {transform_indices = @transform_3, window_bounds = array<i64: 16, 128>}]} {
    %c0_i32 = arith.constant 0 : i32
    %0 = arith.cmpi eq, %arg2, %c0_i32 : i32
    %1 = arith.extui %0 : i1 to i32
    %c0_i32_0 = arith.constant 0 : i32
    %2 = arith.cmpi ne, %1, %c0_i32_0 : i32
    scf.if %2 {
      %c0_8 = arith.constant 0 : index
      %c0_9 = arith.constant 0 : index
      %9 = vector.load %arg5[%c0_8, %c0_9] : memref<1x128xf32, #tpu.memory_space<vmem>>, vector<1x128xf32>
      %10 = vector.shape_cast %9 : vector<1x128xf32> to vector<1x128xf32>
      %11 = vector.broadcast %10 : vector<1x128xf32> to vector<16x128xf32>
      %c0_10 = arith.constant 0 : index
      %c0_11 = arith.constant 0 : index
      %12 = vector.load %arg6[%c0_10, %c0_11] : memref<16x128xf32, #tpu.memory_space<vmem>>, vector<16x128xf32>
      tpu.vector_store %arg6[%c0_10, %c0_11], %11 {strides = array<i32>} : memref<16x128xf32, #tpu.memory_space<vmem>>, vector<16x128xf32>,
    } else {
    }
    %c0 = arith.constant 0 : index
    %c0_1 = arith.constant 0 : index
    %3 = vector.load %arg6[%c0, %c0_1] : memref<16x128xf32, #tpu.memory_space<vmem>>, vector<16x128xf32>
    %c0_2 = arith.constant 0 : index
    %c0_3 = arith.constant 0 : index
    %4 = vector.load %arg3[%c0_2, %c0_3] : memref<16x128xbf16, #tpu.memory_space<vmem>>, vector<16x128xbf16>
    %c0_4 = arith.constant 0 : index
    %c0_5 = arith.constant 0 : index
    %5 = vector.load %arg4[%c0_4, %c0_5] : memref<128x128xbf16, #tpu.memory_space<vmem>>, vector<128x128xbf16>
    %cst = arith.constant dense<0.000000e+00> : vector<16x128xf32>
    %6 = tpu.matmul %4, %5, %cst {dimension_numbers = #tpu.dot_dimension_numbers<[1], [0], [0], [1], [0, 0, 1, 1], [], []>} : vector<16x128xbf16>, vector<128x128xbf16>, vector<16x128xf32> -> vector<16x128xf32>
    %7 = arith.addf %3, %6 : vector<16x128xf32>
    %c0_6 = arith.constant 0 : index
    %c0_7 = arith.constant 0 : index
    %8 = vector.load %arg6[%c0_6, %c0_7] : memref<16x128xf32, #tpu.memory_space<vmem>>, vector<16x128xf32>
    tpu.vector_store %arg6[%c0_6, %c0_7], %7 {strides = array<i32>} : memref<16x128xf32, #tpu.memory_space<vmem>>, vector<16x128xf32>,
    return
  }
  func.func @transform_0(%arg0: i32, %arg1: i32, %arg2: i32) -> (i32, i32) {
    %c0_i32 = arith.constant 0 : i32
    return %arg0, %arg2 : i32, i32
  }
  func.func @transform_1(%arg0: i32, %arg1: i32, %arg2: i32) -> (i32, i32) {
    %c0_i32 = arith.constant 0 : i32
    return %arg2, %arg1 : i32, i32
  }
  func.func @transform_2(%arg0: i32, %arg1: i32, %arg2: i32) -> (i32, i32) {
    %c0_i32 = arith.constant 0 : i32
    %c0_i32_0 = arith.constant 0 : i32
    return %c0_i32, %arg1 : i32, i32
  }
  func.func @transform_3(%arg0: i32, %arg1: i32, %arg2: i32) -> (i32, i32) {
    %c0_i32 = arith.constant 0 : i32
    return %arg0, %arg1 : i32, i32
  }
}

</mosaic_0001>

<bundles_post_ra>
// kernel: _bquant_matmul.1
= control target key start
LH: loop header
LB: loop body
LE: loop exit
PB: predicated region body
PF: predicated region fallthrough
CT: control target
= control target key end

     0   :  { %8 = vsyncpa [#allocation3], 0  ;;  %s358_s0 = inlined_call_operand.hbm [shape: bf16[16,128], index: 0, kind: input, shape index: {}]   ;;  %s359_s1 = inlined_call_operand.hbm [shape: bf16[128,128], index: 1, kind: input, shape index: {}]   ;;  %s360_s2 = inlined_call_operand.vmem [shape: f32[1,128], index: 2, kind: input, shape index: {}]   ;;  %s361_s3 = inlined_call_operand.hbm [shape: f32[16,128], index: 3, kind: output, shape index: {}]  }
   0x1   :  { %9 = vsyncpa [#allocation6], 0 }
   0x2   :  { %10 = vsyncpa [#allocation4], 0  ;;  %s317_s12 = smov [#allocation2]  }
   0x3   :  { %s16_s13 = sshll.u32 %s317_s12, 4  ;;  %s17_s13 = int_to_ptr.vmem [resolvable:$true] %s16_s13 }
   0x4   :  { %s259_s14 = scalar_lea.vmem %s17_s13, 128  ;;  %p264_p1 = scmp.lt.s32.totalorder %s17_s13, %s17_s13 }
   0x5   :  { %p260_p0 = scmp.ne.s32.totalorder %s17_s13, %s259_s14  ;;  %p265_p2 = scmp.lt.s32.totalorder %s259_s14, %s259_s14 }
   0x7   :  { %p266_p3 = por %p265_p2, %p264_p1 }
   0x9   :  { %p267_p4 = pnand %p266_p3, %p260_p0 }
   0xb   :  { %270 = shalt.err (!%p267_p4)
}
   0xc   :  { %s318_s15 = smov 64   ;;  %s319_s16 = smov 4  }
   0xd   :  { %22 = dma.hbm_to_vmem [thread:$0]  %s358_s0, 128, %s17_s13, [#allocation3], %s318_s15, %s318_s15, %s319_s16  }
   0xe   :  { %s320_s19 = smov [#allocation5]  }
   0xf   :  { %s28_s20 = sshll.u32 %s320_s19, 4  ;;  %s29_s20 = int_to_ptr.vmem [resolvable:$true] %s28_s20 }
  0x10   :  { %s279_s21 = scalar_lea.vmem %s29_s20, 1024  ;;  %p284_p6 = scmp.lt.s32.totalorder %s29_s20, %s29_s20 }
  0x11   :  { %p280_p5 = scmp.ne.s32.totalorder %s29_s20, %s279_s21  ;;  %p285_p7 = scmp.lt.s32.totalorder %s279_s21, %s279_s21 }
  0x13   :  { %p286_p8 = por %p285_p7, %p284_p6 }
  0x15   :  { %p287_p9 = pnand %p286_p8, %p280_p5 }
  0x17   :  { %290 = shalt.err (!%p287_p9)
}
  0x18   :  { %34 = dma.hbm_to_vmem [thread:$0]  %s359_s1, 1024, %s29_s20, [#allocation6], %s318_s15, %s318_s15, %s319_s16  }
  0x19   :  { %311 = dma.done.wait [#allocation3], 128  }
  0x1a   :  { %312 = vsyncadd [#allocation3], 4294967168 }
  0x1b   :  { %313 = dma.done.wait [#allocation6], 1024  }
  0x1c   :  { %314 = vsyncadd [#allocation6], 4294966272  ;;  %v321_v0 = vmov 0.0   ;;  %vm322_vm0 = vmmov 0   ;;  %v242_v1 = vld [vmem:[#allocation5 + $0x38] sm:$0xff]   ;;  %v243_v2 = vld [vmem:[#allocation5 + $0x30] sm:$0xff]  }
  0x1d   :  { %213 = vmatprep.subr.bf16.mxu0 %v321_v0  ;;  %229 = vmatprep.mubr.msk.bf16.mxu0 %vm322_vm0, %v321_v0  ;;  %v244_v3 = vld [vmem:[#allocation5 + $0x28] sm:$0xff]   ;;  %v245_v4 = vld [vmem:[#allocation5 + $0x20] sm:$0xff]   ;;  %v246_v5 = vld [vmem:[#allocation5 + $0x18] sm:$0xff]   ;;  %s323_s24 = smov [#allocation7]  }
  0x1e   :  { %214 = vmatpush3.bf16.msra.mxu0 %v242_v1  ;;  %v247_v6 = vld [vmem:[#allocation5 + $0x10] sm:$0xff]   ;;  %v248_v7 = vld [vmem:[#allocation5 + $0x8] sm:$0xff]   ;;  %v249_v8 = vld [vmem:[#allocation5] sm:$0xff]   ;;  %s181_s25 = sshll.u32 %s323_s24, 4  ;;  %s182_s25 = int_to_ptr.vmem [resolvable:$true] %s181_s25 }
  0x1f   :  { %215 = vmatprep.subr.bf16.mxu0 %v321_v0  ;;  %v250_v9 = vld [vmem:[#allocation2] sm:$0xff]   ;;  %s291_s26 = scalar_lea.vmem %s182_s25, 256  ;;  %p296_p11 = scmp.lt.s32.totalorder %s182_s25, %s182_s25 }
  0x20   :  { %v194_v10 = vld [vmem:[%s360_s2] ss:$0 sm:$0xff]  ;;  %p292_p10 = scmp.ne.s32.totalorder %s182_s25, %s291_s26  ;;  %p297_p12 = scmp.lt.s32.totalorder %s291_s26, %s291_s26 }
  0x22   :  { %216 = vmatpush3.bf16.msra.mxu0 %v243_v2  ;;  %p298_p13 = por %p297_p12, %p296_p11 }
  0x23   :  { %217 = vmatprep.subr.bf16.mxu0 %v321_v0 }
  0x24   :  { %p299_p0 = pnand %p298_p13, %p292_p10 }
  0x26   :  { %218 = vmatpush3.bf16.msra.mxu0 %v244_v3 }
  0x27   :  { %219 = vmatprep.subr.bf16.mxu0 %v321_v0 }
  0x2a   :  { %220 = vmatpush3.bf16.msra.mxu0 %v245_v4 }
  0x2b   :  { %221 = vmatprep.subr.bf16.mxu0 %v321_v0 }
  0x2e   :  { %222 = vmatpush3.bf16.msra.mxu0 %v246_v5 }
  0x2f   :  { %223 = vmatprep.subr.bf16.mxu0 %v321_v0 }
  0x32   :  { %224 = vmatpush3.bf16.msra.mxu0 %v247_v6 }
  0x33   :  { %225 = vmatprep.subr.bf16.mxu0 %v321_v0 }
  0x36   :  { %226 = vmatpush3.bf16.msra.mxu0 %v248_v7 }
  0x37   :  { %227 = vmatprep.subr.bf16.mxu0 %v321_v0 }
  0x3a   :  { %228 = vmatpush3.bf16.msra.mxu0 %v249_v8 }
  0x3d   :  { %230 = vmatmul.mubr.bf16.vlgmr.msra.gmra.mxu0 %v250_v9 }
  0xfd   :  { %v165_v11 = vpop.f32.mrf.mxu0 }
  0xfe   :  { %v172_v12 = vadd.f32 %v194_v10, %v165_v11 }
  0xff   :  { %v231_v13 = vpop.f32.mrf.mxu0 }
 0x100   :  { %174 = vst [vmem:[#allocation7] sm:$0xff] %v172_v12 }
 0x101   :  { %v168_v14 = vpop.f32.mrf.mxu0 }
 0x102   :  { %v173_v15 = vadd.f32 %v194_v10, %v168_v14 }
 0x103   :  { %v232_v16 = vpop.f32.mrf.mxu0 }
 0x104   :  { %175 = vst [vmem:[#allocation7 + $0x8] sm:$0xff] %v173_v15 }
 0x105   :  { %302 = shalt.err (!%p299_p0)
}
 0x106   :  { %s324_s27 = smov 128   ;;  %s325_s2 = smov 8  }
 0x107   :  { %187 = dma.vmem_to_hbm [thread:$0]  %s182_s25, 256, %s361_s3, [#allocation4], %s324_s27, %s324_s27, %s325_s2  }
 0x108   :  { %315 = dma.done.wait [#allocation4], 256  }
 0x109   :  { %316 = vsyncadd [#allocation4], 4294967040 }
 0x10a   :  { %191 = vsyncpa [#allocation3], 1 }
 0x10b   :  { %192 = vsyncpa [#allocation6], 1 }
 0x10c   :  { %193 = vsyncpa [#allocation4], 1 }

</bundles_post_ra>
